<compile_context>
chip_gen: v7x
topology: tpu7x:2x2x1
jax: 0.10.0
libtpu: 0.0.40
codegen_flags: <defaults>
</compile_context>

<pallas_src>
import jax
import jax.numpy as jnp
from jax import lax
from jax.experimental import pallas as pl
from jax.experimental.pallas import tpu as pltpu

# Tile caps — sized so (A + W + O double-buffered + acc scratch) stays ~3 MiB,
# safely inside the default scoped-VMEM budgets of v5e (16 MiB), v6e (32 MiB)
# and v7x's 64 MiB physical VMEM.
TM_CAP = 512   # rows (M)
TN_CAP = 256   # output channels (lane axis)
TK_CAP = 512   # contraction (bf16 inputs)

_VMEM_LIMIT = 48 * 1024 * 1024


def _round_up(x, m):
    return ((x + m - 1) // m) * m


# ----------------------------- Pallas kernels ------------------------------ #

def _mm_stats_kernel(a_ref, b_ref, o_ref, st_ref, acc_ref):
    """Tiled matmul (bf16 in, f32 acc) + fused per-tile column sum / sum-of-squares."""
    k = pl.program_id(2)

    @pl.when(k == 0)
    def _():
        acc_ref[...] = jnp.zeros_like(acc_ref)

    acc_ref[...] += jnp.dot(a_ref[...], b_ref[...],
                            preferred_element_type=jnp.float32)

    @pl.when(k == pl.num_programs(2) - 1)
    def _():
        acc = acc_ref[...]
        o_ref[...] = acc.astype(o_ref.dtype)
        s = jnp.sum(acc, axis=0, keepdims=True)            # (1, TN)
        s2 = jnp.sum(acc * acc, axis=0, keepdims=True)     # (1, TN)
        row = lax.broadcasted_iota(jnp.int32, st_ref.shape, 0)
        st_ref[...] = jnp.where(row == 0, s, jnp.where(row == 1, s2, 0.0))


def _mm_lrelu_kernel(a_ref, b_ref, o_ref, acc_ref):
    """Tiled matmul with LeakyReLU(0.2) fused into the epilogue (no-BN layer)."""
    k = pl.program_id(2)

    @pl.when(k == 0)
    def _():
        acc_ref[...] = jnp.zeros_like(acc_ref)

    acc_ref[...] += jnp.dot(a_ref[...], b_ref[...],
                            preferred_element_type=jnp.float32)

    @pl.when(k == pl.num_programs(2) - 1)
    def _():
        acc = acc_ref[...]
        o_ref[...] = jnp.where(acc >= 0.0, acc, 0.2 * acc).astype(o_ref.dtype)


def _affine_lrelu_kernel(x_ref, scale_ref, shift_ref, o_ref):
    # y = x * scale + shift ; LeakyReLU(0.2)   (BN affine folded per channel)
    y = x_ref[...] * scale_ref[...] + shift_ref[...]
    o_ref[...] = jnp.where(y >= 0.0, y, 0.2 * y)


# ----------------------------- Kernel wrappers ------------------------------ #

def pallas_conv_matmul(a, w, *, with_stats, tm, tn, tk):
    """a: (Mp, Kp) bf16, w: (Kp, Cop) bf16.  All dims are multiples of the tiles.

    Returns y (Mp, Cop) f32  [and a (8*Mtiles, Cop) stats slab when with_stats]."""
    Mp, Kp = a.shape
    Cop = w.shape[1]
    grid = (Mp // tm, Cop // tn, Kp // tk)

    a_spec = pl.BlockSpec((tm, tk), lambda i, j, k: (i, k))
    b_spec = pl.BlockSpec((tk, tn), lambda i, j, k: (k, j))
    o_spec = pl.BlockSpec((tm, tn), lambda i, j, k: (i, j))
    scratch = [pltpu.VMEM((tm, tn), jnp.float32)]
    cparams = pltpu.CompilerParams(
        dimension_semantics=("parallel", "parallel", "arbitrary"),
        vmem_limit_bytes=_VMEM_LIMIT)

    if with_stats:
        out_shape = (jax.ShapeDtypeStruct((Mp, Cop), jnp.float32),
                     jax.ShapeDtypeStruct((8 * grid[0], Cop), jnp.float32))
        out_specs = (o_spec,
                     pl.BlockSpec((8, tn), lambda i, j, k: (i, j)))
        return pl.pallas_call(
            _mm_stats_kernel,
            out_shape=out_shape,
            grid_spec=pltpu.PrefetchScalarGridSpec(
                num_scalar_prefetch=0, grid=grid,
                in_specs=[a_spec, b_spec], out_specs=out_specs,
                scratch_shapes=scratch),
            compiler_params=cparams,
        )(a, w)
    else:
        return pl.pallas_call(
            _mm_lrelu_kernel,
            out_shape=jax.ShapeDtypeStruct((Mp, Cop), jnp.float32),
            grid_spec=pltpu.PrefetchScalarGridSpec(
                num_scalar_prefetch=0, grid=grid,
                in_specs=[a_spec, b_spec], out_specs=o_spec,
                scratch_shapes=scratch),
            compiler_params=cparams,
        )(a, w)


def pallas_affine_lrelu(x, scale, shift, *, tm):
    """x: (Mp, Cop) f32; scale/shift: (Cop,) per-channel; Mp % tm == 0."""
    Mp, Cop = x.shape
    scale2 = scale.reshape(1, Cop).astype(jnp.float32)
    shift2 = shift.reshape(1, Cop).astype(jnp.float32)
    return pl.pallas_call(
        _affine_lrelu_kernel,
        out_shape=jax.ShapeDtypeStruct((Mp, Cop), jnp.float32),
        grid_spec=pltpu.PrefetchScalarGridSpec(
            num_scalar_prefetch=0, grid=(Mp // tm,),
            in_specs=[pl.BlockSpec((tm, Cop), lambda i: (i, 0)),
                      pl.BlockSpec((1, Cop), lambda i: (0, 0)),
                      pl.BlockSpec((1, Cop), lambda i: (0, 0))],
            out_specs=pl.BlockSpec((tm, Cop), lambda i: (i, 0))),
        compiler_params=pltpu.CompilerParams(
            dimension_semantics=("parallel",),
            vmem_limit_bytes=_VMEM_LIMIT),
    )(x, scale2, shift2)


# ------------------------------- JAX glue ---------------------------------- #

def _im2col_nhwc(x, K, stride, pad):
    """x: (N,H,W,C) -> patches (N*Ho*Wo, K*K*C) ordered (dh, dw, c)."""
    N, H, W, C = x.shape
    xp = jnp.pad(x, ((0, 0), (pad, pad), (pad, pad), (0, 0)))
    Ho = (H + 2 * pad - K) // stride + 1
    Wo = (W + 2 * pad - K) // stride + 1
    cols = []
    for dh in range(K):
        for dw in range(K):
            cols.append(xp[:, dh:dh + stride * (Ho - 1) + 1:stride,
                            dw:dw + stride * (Wo - 1) + 1:stride, :])
    patches = jnp.concatenate(cols, axis=-1)            # (N, Ho, Wo, K*K*C)
    return patches.reshape(N * Ho * Wo, K * K * C), (N, Ho, Wo)


def conv_bn_lrelu(x_nhwc, w_oihw, K, stride, pad, gamma=None, beta=None, eps=1e-5):
    """Conv2d(bias=False) [+ BatchNorm2d (train mode)] + LeakyReLU(0.2)."""
    patches, (N, Ho, Wo) = _im2col_nhwc(x_nhwc, K, stride, pad)
    M, Kd = patches.shape
    Co = w_oihw.shape[0]
    # PyTorch weight (Co, Ci, Kh, Kw) -> (Kh, Kw, Ci, Co) -> (Kd, Co), matching
    # the (dh, dw, c) patch ordering above.
    w = jnp.transpose(w_oihw, (2, 3, 1, 0)).reshape(Kd, Co)

    # Tile sizes (lane-dense, K zero-padded to a multiple of 128 for MXU feed).
    tm = min(TM_CAP, _round_up(M, 8))
    tn = min(TN_CAP, _round_up(Co, 128))
    tk = min(TK_CAP, _round_up(Kd, 128))
    Mp = _round_up(M, tm)
    Cop = _round_up(Co, tn)
    Kp = _round_up(Kd, tk)

    # bf16 operands for the MXU, f32 accumulation inside the kernel.
    a = jnp.pad(patches.astype(jnp.bfloat16), ((0, Mp - M), (0, Kp - Kd)))
    wb = jnp.pad(w.astype(jnp.bfloat16), ((0, Kp - Kd), (0, Cop - Co)))

    if gamma is None:
        # LeakyReLU fused into the matmul epilogue; no separate elementwise pass.
        z = pallas_conv_matmul(a, wb, with_stats=False, tm=tm, tn=tn, tk=tk)
    else:
        y, stats = pallas_conv_matmul(a, wb, with_stats=True, tm=tm, tn=tn, tk=tk)
        st = stats.reshape(Mp // tm, 8, Cop)
        colsum = jnp.sum(st[:, 0, :Co], axis=0)          # padded rows contribute 0
        colsumsq = jnp.sum(st[:, 1, :Co], axis=0)
        mean = colsum / M
        var = jnp.maximum(colsumsq / M - mean * mean, 0.0)  # biased, BN training mode
        inv = gamma / jnp.sqrt(var + eps)
        scale = jnp.ones((Cop,), jnp.float32).at[:Co].set(inv)
        shift = jnp.zeros((Cop,), jnp.float32).at[:Co].set(beta - mean * inv)
        z = pallas_affine_lrelu(y, scale, shift, tm=tm)

    return z[:M, :Co].reshape(N, Ho, Wo, Co)


# ------------------------------ Module setup -------------------------------- #

def layer_specs(ndf):
    # (Cin, Cout, K, stride, pad, has_bn) -- mirrors encode_img in define_module
    return [
        (3,        ndf,       4, 2, 1, False),
        (ndf,      ndf * 2,   4, 2, 1, True),
        (ndf * 2,  ndf * 4,   4, 2, 1, True),
        (ndf * 4,  ndf * 8,   4, 2, 1, True),
        (ndf * 8,  ndf * 16,  4, 2, 1, True),
        (ndf * 16, ndf * 16,  3, 1, 1, True),   # conv3x3
        (ndf * 16, ndf * 8,   3, 1, 1, True),   # conv3x3
    ]


def init_params(key, ndf):
    params = []
    for i, (ci, co, k, s, p, bn) in enumerate(layer_specs(ndf)):
        kw, kg, kb = jax.random.split(jax.random.fold_in(key, i), 3)
        w = 0.02 * jax.random.normal(kw, (co, ci, k, k), jnp.float32)  # DCGAN-style init
        gamma = (1.0 + 0.02 * jax.random.normal(kg, (co,), jnp.float32)) if bn else None
        beta = (0.02 * jax.random.normal(kb, (co,), jnp.float32)) if bn else None
        params.append(dict(w=w, gamma=gamma, beta=beta, k=k, s=s, p=p))
    return params


def stage2_d_img_forward(image_nchw, params):
    """STAGE2_D_IMG.forward: image (N,3,H,W) -> img_embedding (N, ndf*8, H/32, W/32)."""
    x = jnp.transpose(image_nchw, (0, 2, 3, 1))          # NCHW -> NHWC
    for lp in params:
        x = conv_bn_lrelu(x, lp["w"], lp["k"], lp["s"], lp["p"],
                          lp["gamma"], lp["beta"])
    return jnp.transpose(x, (0, 3, 1, 2))                # NHWC -> NCHW

# TODO(synk): get_cond_logits / get_uncond_logits / cate_classify heads are defined
# in __init__ but unused by STAGE2_D_IMG.forward, so they are not implemented here.


if __name__ == "__main__":
    key = jax.random.PRNGKey(0)
    ndf = 4                                              # small cfg.GAN.DF_DIM
    image = jax.random.normal(jax.random.fold_in(key, 100), (2, 3, 64, 64), jnp.float32)
    params = init_params(key, ndf)

    out = stage2_d_img_forward(image, params)
    out = jax.block_until_ready(out)
    assert out.shape == (2, ndf * 8, 2, 2), out.shape    # 64 -> 32 -> 16 -> 8 -> 4 -> 2
    assert jnp.all(jnp.isfinite(out))
    print("KERNEL_OK")
</pallas_src>

<mosaic_0001>
module attributes {stable_mosaic.version = 11 : i64} {
  func.func @_mm_lrelu_kernel(%arg0: i32, %arg1: i32, %arg2: i32, %arg3: memref<512x128xbf16, #tpu.memory_space<vmem>>, %arg4: memref<128x128xbf16, #tpu.memory_space<vmem>>, %arg5: memref<512x128xf32, #tpu.memory_space<vmem>>, %arg6: memref<512x128xf32, #tpu.memory_space<vmem>>) attributes {dimension_semantics = [#tpu.dimension_semantics<parallel>, #tpu.dimension_semantics<parallel>, #tpu.dimension_semantics<arbitrary>], iteration_bounds = array<i64: 4, 1, 1>, scalar_prefetch = 0 : i64, scratch_operands = 1 : i64, tpu.core_type = #tpu.core_type<tc>, window_params = [{transform_indices = @transform_0, window_bounds = array<i64: 512, 128>}, {transform_indices = @transform_1, window_bounds = array<i64: 128, 128>}, {transform_indices = @transform_2, window_bounds = array<i64: 512, 128>}]} {
    %c0_i32 = arith.constant 0 : i32
    %0 = arith.cmpi eq, %arg2, %c0_i32 : i32
    %1 = arith.extui %0 : i1 to i32
    %c0_i32_0 = arith.constant 0 : i32
    %2 = arith.cmpi ne, %1, %c0_i32_0 : i32
    scf.if %2 {
      %cst_10 = arith.constant 0.000000e+00 : f32
      %12 = vector.broadcast %cst_10 : f32 to vector<512x128xf32>
      %c0_11 = arith.constant 0 : index
      %c0_12 = arith.constant 0 : index
      %13 = vector.load %arg6[%c0_11, %c0_12] : memref<512x128xf32, #tpu.memory_space<vmem>>, vector<512x128xf32>
      tpu.vector_store %arg6[%c0_11, %c0_12], %12 {strides = array<i32>} : memref<512x128xf32, #tpu.memory_space<vmem>>, vector<512x128xf32>,
    } else {
    }
    %c0 = arith.constant 0 : index
    %c0_1 = arith.constant 0 : index
    %3 = vector.load %arg6[%c0, %c0_1] : memref<512x128xf32, #tpu.memory_space<vmem>>, vector<512x128xf32>
    %c0_2 = arith.constant 0 : index
    %c0_3 = arith.constant 0 : index
    %4 = vector.load %arg3[%c0_2, %c0_3] : memref<512x128xbf16, #tpu.memory_space<vmem>>, vector<512x128xbf16>
    %c0_4 = arith.constant 0 : index
    %c0_5 = arith.constant 0 : index
    %5 = vector.load %arg4[%c0_4, %c0_5] : memref<128x128xbf16, #tpu.memory_space<vmem>>, vector<128x128xbf16>
    %cst = arith.constant dense<0.000000e+00> : vector<512x128xf32>
    %6 = tpu.matmul %4, %5, %cst {dimension_numbers = #tpu.dot_dimension_numbers<[1], [0], [0], [1], [0, 0, 1, 1], [], []>} : vector<512x128xbf16>, vector<128x128xbf16>, vector<512x128xf32> -> vector<512x128xf32>
    %7 = arith.addf %3, %6 : vector<512x128xf32>
    %c0_6 = arith.constant 0 : index
    %c0_7 = arith.constant 0 : index
    %8 = vector.load %arg6[%c0_6, %c0_7] : memref<512x128xf32, #tpu.memory_space<vmem>>, vector<512x128xf32>
    tpu.vector_store %arg6[%c0_6, %c0_7], %7 {strides = array<i32>} : memref<512x128xf32, #tpu.memory_space<vmem>>, vector<512x128xf32>,
    %c0_i32_8 = arith.constant 0 : i32
    %9 = arith.cmpi eq, %arg2, %c0_i32_8 : i32
    %10 = arith.extui %9 : i1 to i32
    %c0_i32_9 = arith.constant 0 : i32
    %11 = arith.cmpi ne, %10, %c0_i32_9 : i32
    scf.if %11 {
      %c0_10 = arith.constant 0 : index
      %c0_11 = arith.constant 0 : index
      %12 = vector.load %arg6[%c0_10, %c0_11] : memref<512x128xf32, #tpu.memory_space<vmem>>, vector<512x128xf32>
      %cst_12 = arith.constant 0.000000e+00 : f32
      %13 = vector.broadcast %cst_12 : f32 to vector<512x128xf32>
      %14 = arith.cmpf oge, %12, %13 : vector<512x128xf32>
      %cst_13 = arith.constant 2.000000e-01 : f32
      %15 = vector.broadcast %cst_13 : f32 to vector<512x128xf32>
      %16 = arith.mulf %15, %12 : vector<512x128xf32>
      %17 = arith.select %14, %12, %16 : vector<512x128xi1>, vector<512x128xf32>
      %c0_14 = arith.constant 0 : index
      %c0_15 = arith.constant 0 : index
      %18 = vector.load %arg5[%c0_14, %c0_15] : memref<512x128xf32, #tpu.memory_space<vmem>>, vector<512x128xf32>
      tpu.vector_store %arg5[%c0_14, %c0_15], %17 {strides = array<i32>} : memref<512x128xf32, #tpu.memory_space<vmem>>, vector<512x128xf32>,
    } else {
    }
    return
  }
  func.func @transform_0(%arg0: i32, %arg1: i32, %arg2: i32) -> (i32, i32) {
    %c0_i32 = arith.constant 0 : i32
    return %arg0, %arg2 : i32, i32
  }
  func.func @transform_1(%arg0: i32, %arg1: i32, %arg2: i32) -> (i32, i32) {
    %c0_i32 = arith.constant 0 : i32
    return %arg2, %arg1 : i32, i32
  }
  func.func @transform_2(%arg0: i32, %arg1: i32, %arg2: i32) -> (i32, i32) {
    %c0_i32 = arith.constant 0 : i32
    return %arg0, %arg1 : i32, i32
  }
}

</mosaic_0001>

<bundles_post_ra>
// kernel: tpu_custom_call.1
= control target key start
LH: loop header
LB: loop body
LE: loop exit
PB: predicated region body
PF: predicated region fallthrough
CT: control target
= control target key end

     0   :  { %7 = vsyncpa [#allocation4], 0  ;;  %s2331_s0 = inlined_call_operand.hbm [shape: bf16[2048,128], index: 0, kind: input, shape index: {}]   ;;  %s2332_s1 = inlined_call_operand.hbm [shape: bf16[128,128], index: 1, kind: input, shape index: {}]   ;;  %s2333_s2 = inlined_call_operand.hbm [shape: f32[2048,128], index: 2, kind: output, shape index: {}]  }
   0x1   :  { %9 = vsyncpa [#allocation4 + $0x1], 0 }
   0x2   :  { %10 = vsyncpa [#allocation7], 0 }
   0x3   :  { %11 = vsyncpa [#allocation5], 0 }
   0x4   :  { %13 = vsyncpa [#allocation5 + $0x1], 0  ;;  %s2005_s9 = smov 0   ;;  %s2007_s10 = smov 0  }
   0x5   :  { %s2009_s11 = smov 0   ;;  %s2011_s12 = smov 0  }
   0x6   :  { %s2013_s13 = smov 0   ;;  %s2015_s14 = smov 0  }
   0x7 LB: > { %s1525_s15 = sadd.s32 4294967295, %s1981_s14   ;;  %s1526_s16 = sadd.s32 4294967294, %s1981_s14   ;;  %s1981_s14 = sphi %s2015_s14, %s19_s14   ;;  %s1977_s13 = sphi %s2013_s13, %s2356_s13   ;;  %s1973_s12 = sphi %s2011_s12, %s2355_s12   ;;  %s1969_s11 = sphi %s2009_s11, %s2354_s11   ;;  %s1965_s10 = sphi %s2007_s10, %s2353_s10   ;;  %s1961_s9 = sphi %s2005_s9, %s2352_s9  }
   0x8   : > { %p60_p0 = scmp.ne.s32.totalorder %s1965_s10, %s1961_s9  ;;  %p2039_p1 = scmp.eq.s32.totalorder %s1525_s15, 0 }
   0x9   : > { %p2043_p2 = scmp.eq.s32.totalorder %s1525_s15, 3  ;;  %p120_p3 = scmp.eq.s32.totalorder %s1526_s16, 3 }
   0xa   : > { %s2338_s17 = scalar_select %p2039_p1, 1, 0 }
   0xb   : > { %s2339_s18 = scalar_select %p2043_p2, 1, 0 }
   0xc   : > { %p2049_p4 = por %p2039_p1, %p60_p0  ;;  %p1527_p5 = scmp.ge.s32.totalorder %s1981_s14, 1 }
   0xd   : > { %p2054_p6 = por %p120_p3, %p60_p0  ;;  %p127_p7 = scmp.lt.s32.totalorder %s1981_s14, 5 }
   0xe   : > { %s2340_s19 = scalar_select %p2049_p4, 1, 0 }
   0xf   : > { %s2341_s20 = scalar_select %p2054_p6, 1, 0 }
  0x10   : > { %p2059_p8 = pnand %p1527_p5, %p127_p7  ;;  %s1983_s22 = smov [#allocation6]  }
  0x11   : > { %s143_s23 = sshll.u32 %s1983_s22, 4  ;;  %s38_s25 = sadd.s32 1, %s1977_s13  ;;  %s144_s23 = int_to_ptr.vmem [resolvable:$true] %s143_s23 }
  0x12   : > { %s2342_s21 = scalar_select %p2059_p8, 1, 0 }
  0x13   : > { %p1728_p9 = pneg %p2059_p8  ;;  %s1837_s28 = scalar_lea.hbm %s2332_s1, 1024 }
  0x14   : > { %p1838_p11 = scmp.ne.s32.totalorder %s2332_s1, %s1837_s28  ;;  %p1844_p3 = scmp.lt.u32.totalorder %s1837_s28, %s2332_s1 }
  0x15   : > { %p2067_p10 = pnand %p1728_p9, %p2039_p1 }
  0x17   : > { %p1839_p12 = pneg %p2067_p10 }
  0x19   : > { %p1840_p13 = pnand %p1839_p12, %p1838_p11 }
  0x1b   : > { %p1841_p0 = pneg %p1840_p13 }
  0x1d   : > { %p1846_p5 = pnand %p1844_p3, %p1841_p0 }
  0x1f   : > { %1849 = shalt.err (!%p1846_p5)
}
  0x20   : > { %s1850_s5 = scalar_lea.vmem %s144_s23, 1024  ;;  %p1858_p1 = scmp.lt.s32.totalorder %s144_s23, %s144_s23 }
  0x21   : > { %p1851_p7 = scmp.ne.s32.totalorder %s144_s23, %s1850_s5  ;;  %p1859_p4 = scmp.lt.s32.totalorder %s1850_s5, %s1850_s5 }
  0x23   : > { %p1853_p9 = pnand %p1851_p7, %p1839_p12  ;;  %p1860_p8 = por %p1859_p4, %p1858_p1 }
  0x25   : > { %p1854_p6 = pneg %p1853_p9 }
  0x27   : > { %p1861_p2 = pnand %p1860_p8, %p1854_p6 }
  0x29   : > { %1864 = shalt.err (!%p1861_p2)
}
  0x2a   : > { %s1984_s6 = smov 64   ;;  %s1985_s7 = smov 4  }
  0x2b   : > { %1731 = dma.hbm_to_vmem [thread:$0]  (!%p2067_p10), %s2332_s1, 1024, %s144_s23, [#allocation7], %s1984_s6, %s1984_s6, %s1985_s7  }
  0x2c   : > { %p40_p1 = scmp.ge.s32.totalorder %s38_s25, 4  ;;  %s47_s16 = sadd.s32 1, %s1969_s11 }
  0x2d   : > { %p54_p2 = scmp.ne.s32.totalorder %s1969_s11, %s1965_s10  ;;  %p55_p4 = scmp.eq.s32.totalorder %s1981_s14, 0 }
  0x2e   : > { %s2358_s25 = smov (%p40_p1, %s38_s25), 0  ;;  %p2345_p8 = scmp.ne.s32.totalorder %s2339_s18, 0 }
  0x2f   : > { %p2097_p6 = por %p55_p4, %p54_p2  ;;  %s42_s26 = ssub.s32 %s1977_s13, %s2358_s25 }
  0x30   : > { %p2103_p11 = por %p2345_p8, %p54_p2  ;;  %p1741_p12 = scmp.lt.s32.totalorder %s1981_s14, 4 }
  0x31   : > { %p45_p10 = scmp.eq.s32.totalorder %s42_s26, 0  ;;  %s157_s23 = sand.u32 1, %s1969_s11  }
  0x32   : > { %s1530_s27 = sshll.u32 %s157_s23, 8  ;;  %s1582_s29 = sshll.u32 %s1977_s13, 12 }
  0x33   : > { %s2112_s28 = scalar_select %p45_p10, %s1969_s11, %s47_s16  }
  0x34   : > { %s2118_s4 = scalar_lea.hbm %s2331_s0, %s1582_s29  ;;  %s161_s18 = scalar_lea.vmem [#allocation3], %s1530_s27 }
  0x35   : > { %s169_s5 = sshll.u32 %s161_s18, 4  ;;  %p2124_p13 = pnand %p1741_p12, %p2097_p6  ;;  %s2120_s5 = int_to_ptr.vmem [resolvable:$true] %s169_s5 }
  0x36   : > { %s2128_s15 = scalar_lea.sflag [#allocation4], %s157_s23  ;;  %s1865_s16 = scalar_lea.hbm %s2118_s4, 4096 }
  0x37   : > { %p1866_p0 = scmp.ne.s32.totalorder %s2118_s4, %s1865_s16  ;;  %p1867_p3 = pneg %p2124_p13 }
  0x38   : > { %s1870_s22 = scalar_lea.hbm %s2331_s0, 16384  ;;  %p1871_p9 = scmp.lt.u32.totalorder %s2118_s4, %s2331_s0 }
  0x39   : > { %p1868_p5 = pnand %p1867_p3, %p1866_p0  ;;  %p1872_p1 = scmp.lt.u32.totalorder %s1870_s22, %s1865_s16 }
  0x3a   : > { %p1874_p4 = scmp.lt.u32.totalorder %s1865_s16, %s2118_s4 }
  0x3b   : > { %p1869_p7 = pneg %p1868_p5  ;;  %p1873_p2 = por %p1872_p1, %p1871_p9 }
  0x3d   : > { %p1875_p6 = por %p1874_p4, %p1873_p2 }
  0x3f   : > { %p1876_p8 = pnand %p1875_p6, %p1869_p7 }
  0x41   : > { %1879 = shalt.err (!%p1876_p8)
}
  0x42   : > { %s1880_s23 = scalar_lea.vmem %s2120_s5, 4096  ;;  %s1986_s3 = smov [#allocation3]  }
  0x43   : > { %p1881_p12 = scmp.ne.s32.totalorder %s2120_s5, %s1880_s23  ;;  %s1885_s18 = sshll.u32 %s1986_s3, 4  ;;  %s1886_s18 = int_to_ptr.vmem [resolvable:$false] %s1885_s18 }
  0x44   : > { %s1887_s26 = scalar_lea.vmem %s1886_s18, 8192  ;;  %p1888_p5 = scmp.lt.s32.totalorder %s2120_s5, %s1886_s18 }
  0x45   : > { %p1883_p10 = pnand %p1881_p12, %p1867_p3  ;;  %p1889_p9 = scmp.lt.s32.totalorder %s1887_s26, %s1880_s23 }
  0x47   : > { %p1884_p0 = pneg %p1883_p10  ;;  %p1890_p1 = por %p1889_p9, %p1888_p5 }
  0x49   : > { %p1891_p2 = pnand %p1890_p1, %p1884_p0 }
  0x4b   : > { %1894 = shalt.err (!%p1891_p2)
}
  0x4c   : > { %1735 = dma.hbm_to_vmem [thread:$0]  (!%p2124_p13), %s2118_s4, 4096, %s2120_s5, %s2128_s15, %s1984_s6, %s1984_s6, %s1985_s7  }
  0x4d   : > { %p2348_p3 = scmp.ne.s32.totalorder %s2342_s21, 0 }
  0x4e   : > { %s2162_s16 = sand.u32 (!%p2348_p3), 1, %s1965_s10   ;;  %p2349_p7 = scmp.ne.s32.totalorder (!%p2348_p3), %s2340_s19, 0 }
  0x4f   : > { %181 = sbr.rel (%p2348_p3) target bundleno = 415 (0x19f), region = 28  ;;  %s1534_s27 = sshll.u32 (!%p2348_p3), %s2162_s16, 8 }
  0x50   : > { %s184_s22 = scalar_lea.sflag (!%p2348_p3), [#allocation4], %s2162_s16  ;;  %s2166_s29 = scalar_lea.vmem (!%p2348_p3), [#allocation3], %s1534_s27 }
  0x56   : > { %1948 = dma.done.wait (%p2349_p7), %s184_s22, 4096  }
  0x57   : > { %1950 = vsyncadd (%p2349_p7), %s184_s22, 4294963200  ;;  %p2350_p13 = scmp.ne.s32.totalorder %s2338_s17, 0 }
  0x59   : > { %1952 = dma.done.wait (%p2350_p13), [#allocation7], 1024  }
  0x5a   : > { %1954 = vsyncadd (%p2350_p13), [#allocation7], 4294966272  ;;  %v1797_v0 = vld [vmem:[#allocation6] sm:$0xff]   ;;  %v1798_v1 = vld [vmem:[#allocation6 + $0x8] sm:$0xff]   ;;  %s1536_s17 = sshll.u32 %s2162_s16, 9  ;;  %s1583_s21 = sshll.u32 %s1973_s12, 13 }
  0x5b   : > { %1624 = vmatprep.subr.bf16.mxu0 %v1797_v0  ;;  %1704 = vmatprep.subr.bf16.mxu1 %v1797_v0  ;;  %v1799_v2 = vld [vmem:[#allocation6 + $0x10] sm:$0xff]   ;;  %v1800_v3 = vld [vmem:[#allocation6 + $0x18] sm:$0xff]   ;;  %v1805_v4 = vld [vmem:[%s2166_s29] sm:$0xff]   ;;  %s2209_s19 = scalar_lea.vmem [#allocation8], %s1536_s17  ;;  %s2277_s4 = scalar_lea.hbm %s2333_s2, %s1583_s21 }
  0x5c   : > { %1625 = vmatpush3.bf16.msra.mxu0 %v1797_v0  ;;  %1712 = vmatpush3.bf16.msra.mxu1 %v1797_v0  ;;  %v1806_v5 = vld [vmem:[%s2166_s29 + $0x80] sm:$0xff]   ;;  %v1802_v7 = vld [vmem:[#allocation6 + $0x28] sm:$0xff]   ;;  %v1803_v8 = vld [vmem:[#allocation6 + $0x30] sm:$0xff]   ;;  %s1423_s6 = sshll.u32 %s2209_s19, 4  ;;  %s1409_s5 = scalar_lea.sflag [#allocation5], %s2162_s16  ;;  %s2279_s6 = int_to_ptr.vmem [resolvable:$true] %s1423_s6 }
  0x5d   : > { %1626 = vmatprep.subr.bf16.mxu0 %v1798_v1  ;;  %1705 = vmatprep.subr.bf16.mxu1 %v1798_v1  ;;  %v1801_v6 = vld [vmem:[#allocation6 + $0x20] sm:$0xff]   ;;  %v1804_v9 = vld [vmem:[#allocation6 + $0x38] sm:$0xff]   ;;  %v1807_v10 = vld [vmem:[%s2166_s29 + $0x8] sm:$0xff]   ;;  %s1895_s8 = scalar_lea.vmem %s2279_s6, 8192  ;;  %s1987_s15 = smov [#allocation8]  }
  0x5e   : > { %1640 = vmatprep.mubr.bf16.mxu0 %v1805_v4  ;;  %1672 = vmatprep.mubr.bf16.mxu1 %v1806_v5  ;;  %v1808_v11 = vld [vmem:[%s2166_s29 + $0x88] sm:$0xff]   ;;  %v1809_v12 = vld [vmem:[%s2166_s29 + $0x10] sm:$0xff]   ;;  %v1811_v14 = vld [vmem:[%s2166_s29 + $0x18] sm:$0xff]   ;;  %p1896_p4 = scmp.ne.s32.totalorder %s2279_s6, %s1895_s8  ;;  %s1899_s30 = sshll.u32 %s1987_s15, 4  ;;  %s1900_s30 = int_to_ptr.vmem [resolvable:$false] %s1899_s30 }
  0x5f   : > { %v1810_v13 = vld [vmem:[%s2166_s29 + $0x90] sm:$0xff]   ;;  %v1812_v15 = vld [vmem:[%s2166_s29 + $0x98] sm:$0xff]   ;;  %v1813_v16 = vld [vmem:[%s2166_s29 + $0x20] sm:$0xff]   ;;  %s1901_s23 = scalar_lea.vmem %s1900_s30, 16384  ;;  %p1902_p12 = scmp.lt.s32.totalorder %s2279_s6, %s1900_s30 }
  0x60   : > { %1627 = vmatpush3.bf16.msra.mxu0 %v1798_v1  ;;  %1713 = vmatpush3.bf16.msra.mxu1 %v1798_v1  ;;  %v1814_v17 = vld [vmem:[%s2166_s29 + $0xa0] sm:$0xff]   ;;  %v1815_v18 = vld [vmem:[%s2166_s29 + $0x28] sm:$0xff]   ;;  %v1817_v20 = vld [vmem:[%s2166_s29 + $0x30] sm:$0xff]   ;;  %p1897_p6 = pnand %p1896_p4, %p2103_p11  ;;  %p1903_p10 = scmp.lt.s32.totalorder %s1901_s23, %s1895_s8 }
  0x61   : > { %1628 = vmatprep.subr.bf16.mxu0 %v1799_v2  ;;  %1706 = vmatprep.subr.bf16.mxu1 %v1799_v2  ;;  %v1816_v19 = vld [vmem:[%s2166_s29 + $0xa8] sm:$0xff]   ;;  %v1818_v21 = vld [vmem:[%s2166_s29 + $0xb0] sm:$0xff]   ;;  %v1819_v22 = vld [vmem:[%s2166_s29 + $0x38] sm:$0xff]  }
  0x62   : > { %v1820_v23 = vld [vmem:[%s2166_s29 + $0xb8] sm:$0xff]   ;;  %v1821_v24 = vld [vmem:[%s2166_s29 + $0x40] sm:$0xff]   ;;  %v1823_v26 = vld [vmem:[%s2166_s29 + $0x48] sm:$0xff]   ;;  %p1898_p8 = pneg %p1897_p6  ;;  %p1904_p0 = por %p1903_p10, %p1902_p12 }
  0x63   : > { %v1822_v25 = vld [vmem:[%s2166_s29 + $0xc0] sm:$0xff]   ;;  %v1824_v27 = vld [vmem:[%s2166_s29 + $0xc8] sm:$0xff]   ;;  %v1825_v28 = vld [vmem:[%s2166_s29 + $0x50] sm:$0xff]  }
  0x64   : > { %1629 = vmatpush3.bf16.msra.mxu0 %v1799_v2  ;;  %1714 = vmatpush3.bf16.msra.mxu1 %v1799_v2  ;;  %v1826_v29 = vld [vmem:[%s2166_s29 + $0xd0] sm:$0xff]   ;;  %v1827_v30 = vld [vmem:[%s2166_s29 + $0x58] sm:$0xff]   ;;  %v1829_v32 = vld [vmem:[%s2166_s29 + $0x60] sm:$0xff]   ;;  %p1905_p5 = pnand %p1904_p0, %p1898_p8 }
  0x65   : > { %1630 = vmatprep.subr.bf16.mxu0 %v1800_v3  ;;  %1707 = vmatprep.subr.bf16.mxu1 %v1800_v3  ;;  %v1828_v31 = vld [vmem:[%s2166_s29 + $0xd8] sm:$0xff]   ;;  %v1830_v33 = vld [vmem:[%s2166_s29 + $0xe0] sm:$0xff]   ;;  %v1831_v34 = vld [vmem:[%s2166_s29 + $0x68] sm:$0xff]  }
  0x66   : > { %v1832_v35 = vld [vmem:[%s2166_s29 + $0xe8] sm:$0xff]   ;;  %v1833_v36 = vld [vmem:[%s2166_s29 + $0x70] sm:$0xff]   ;;  %v1835_v38 = vld [vmem:[%s2166_s29 + $0x78] sm:$0xff]  }
  0x67   : > { %v1834_v37 = vld [vmem:[%s2166_s29 + $0xf0] sm:$0xff]   ;;  %v1836_v39 = vld [vmem:[%s2166_s29 + $0xf8] sm:$0xff]  }
  0x68   : > { %1631 = vmatpush3.bf16.msra.mxu0 %v1800_v3  ;;  %1715 = vmatpush3.bf16.msra.mxu1 %v1800_v3 }
  0x69   : > { %1632 = vmatprep.subr.bf16.mxu0 %v1801_v6  ;;  %1708 = vmatprep.subr.bf16.mxu1 %v1801_v6 }
  0x6c   : > { %1633 = vmatpush3.bf16.msra.mxu0 %v1801_v6  ;;  %1716 = vmatpush3.bf16.msra.mxu1 %v1801_v6 }
  0x6d   : > { %1634 = vmatprep.subr.bf16.mxu0 %v1802_v7  ;;  %1709 = vmatprep.subr.bf16.mxu1 %v1802_v7 }
  0x70   : > { %1635 = vmatpush3.bf16.msra.mxu0 %v1802_v7  ;;  %1717 = vmatpush3.bf16.msra.mxu1 %v1802_v7 }
  0x71   : > { %1636 = vmatprep.subr.bf16.mxu0 %v1803_v8  ;;  %1710 = vmatprep.subr.bf16.mxu1 %v1803_v8 }
  0x74   : > { %1637 = vmatpush3.bf16.msra.mxu0 %v1803_v8  ;;  %1718 = vmatpush3.bf16.msra.mxu1 %v1803_v8 }
  0x75   : > { %1638 = vmatprep.subr.bf16.mxu0 %v1804_v9  ;;  %1711 = vmatprep.subr.bf16.mxu1 %v1804_v9 }
  0x78   : > { %1639 = vmatpush3.bf16.msra.mxu0 %v1804_v9  ;;  %1719 = vmatpush3.bf16.msra.mxu1 %v1804_v9 }
  0x7b   : > { %1641 = vmatmul.mubr.bf16.vlgmr.msra.gmra.mrb[0].mxu0 %v1807_v10  ;;  %1673 = vmatmul.mubr.bf16.vlgmr.msra.gmra.mrb[0].mxu1 %v1808_v11 }
  0x7c   : > { %1644 = vmatprep.mubr.bf16.mxu0 %v1809_v12  ;;  %1676 = vmatprep.mubr.bf16.mxu1 %v1810_v13 }
  0x83   : > { %1645 = vmatmul.mubr.bf16.gmra.mrb[4].mxu0 %v1811_v14  ;;  %1677 = vmatmul.mubr.bf16.gmra.mrb[4].mxu1 %v1812_v15 }
  0x84   : > { %1648 = vmatprep.mubr.bf16.mxu0 %v1813_v16  ;;  %1680 = vmatprep.mubr.bf16.mxu1 %v1814_v17 }
  0x8b   : > { %1649 = vmatmul.mubr.bf16.gmra.mrb[8].mxu0 %v1815_v18  ;;  %1681 = vmatmul.mubr.bf16.gmra.mrb[8].mxu1 %v1816_v19 }
  0x8c   : > { %1652 = vmatprep.mubr.bf16.mxu0 %v1817_v20  ;;  %1684 = vmatprep.mubr.bf16.mxu1 %v1818_v21 }
  0x93   : > { %1653 = vmatmul.mubr.bf16.gmra.mrb[12].mxu0 %v1819_v22  ;;  %1685 = vmatmul.mubr.bf16.gmra.mrb[12].mxu1 %v1820_v23 }
  0x94   : > { %1656 = vmatprep.mubr.bf16.mxu0 %v1821_v24  ;;  %1688 = vmatprep.mubr.bf16.mxu1 %v1822_v25 }
  0x9b   : > { %1657 = vmatmul.mubr.bf16.gmra.mrb[16].mxu0 %v1823_v26  ;;  %1689 = vmatmul.mubr.bf16.gmra.mrb[16].mxu1 %v1824_v27 }
  0x9c   : > { %1660 = vmatprep.mubr.bf16.mxu0 %v1825_v28  ;;  %1692 = vmatprep.mubr.bf16.mxu1 %v1826_v29 }
  0xa3   : > { %1661 = vmatmul.mubr.bf16.gmra.mrb[20].mxu0 %v1827_v30  ;;  %1693 = vmatmul.mubr.bf16.gmra.mrb[20].mxu1 %v1828_v31 }
  0xa4   : > { %1664 = vmatprep.mubr.bf16.mxu0 %v1829_v32  ;;  %1696 = vmatprep.mubr.bf16.mxu1 %v1830_v33 }
  0xab   : > { %1665 = vmatmul.mubr.bf16.gmra.mrb[24].mxu0 %v1831_v34  ;;  %1697 = vmatmul.mubr.bf16.gmra.mrb[24].mxu1 %v1832_v35 }
  0xac   : > { %1668 = vmatprep.mubr.bf16.mxu0 %v1833_v36  ;;  %1700 = vmatprep.mubr.bf16.mxu1 %v1834_v37 }
  0xb3   : > { %1669 = vmatmul.mubr.bf16.gmra.mrb[28].mxu0 %v1835_v38  ;;  %1701 = vmatmul.mubr.bf16.gmra.mrb[28].mxu1 %v1836_v39 }
 0x14e   : > { %v1642_v40 = vpop.f32.mrb[0].mxu0  ;;  %v1674_v41 = vpop.f32.mrb[0].mxu1 }
 0x14f   : > { %vm1154_vm0 = vcmp.ge.f32.partialorder %v1642_v40, 0.0  ;;  %v1218_v42 = vmul.f32 0.2, %v1642_v40  ;;  %vm1186_vm1 = vcmp.ge.f32.partialorder %v1674_v41, 0.0  ;;  %v1250_v43 = vmul.f32 0.2, %v1674_v41 }
 0x150   : > { %v702_v44 = vpop.f32.mrb[1].mxu0  ;;  %v830_v45 = vpop.f32.mrb[1].mxu1 }
 0x151   : > { %v1282_v46 = vsel %vm1154_vm0, %v1642_v40, %v1218_v42  ;;  %v1314_v47 = vsel %vm1186_vm1, %v1674_v41, %v1250_v43  ;;  %vm1152_vm2 = vcmp.ge.f32.partialorder %v702_v44, 0.0  ;;  %v1216_v48 = vmul.f32 0.2, %v702_v44  ;;  %v1643_v49 = vpop.f32.mrb[2].mxu0  ;;  %v1675_v50 = vpop.f32.mrb[2].mxu1 }
 0x152   : > { %1346 = vst [vmem:[%s2209_s19 + $0x10] sm:$0xff] %v1282_v46  ;;  %1378 = vst [vmem:[%s2209_s19 + $0x110] sm:$0xff] %v1314_v47  ;;  %vm1184_vm3 = vcmp.ge.f32.partialorder %v830_v45, 0.0  ;;  %v1248_v51 = vmul.f32 0.2, %v830_v45  ;;  %vm1155_vm4 = vcmp.ge.f32.partialorder %v1643_v49, 0.0 }
 0x153   : > { %v1219_v52 = vmul.f32 0.2, %v1643_v49  ;;  %v1280_v53 = vsel %vm1152_vm2, %v702_v44, %v1216_v48  ;;  %vm1187_vm5 = vcmp.ge.f32.partialorder %v1675_v50, 0.0  ;;  %v1251_v54 = vmul.f32 0.2, %v1675_v50  ;;  %v705_v55 = vpop.f32.mrb[3].mxu0 }
 0x154   : > { %v833_v56 = vpop.f32.mrb[3].mxu1  ;;  %1344 = vst [vmem:[%s2209_s19] sm:$0xff] %v1280_v53  ;;  %v1312_v57 = vsel %vm1184_vm3, %v830_v45, %v1248_v51  ;;  %vm1153_vm6 = vcmp.ge.f32.partialorder %v705_v55, 0.0  ;;  %v1217_v59 = vmul.f32 0.2, %v705_v55 }
 0x155   : > { %v1283_v58 = vsel %vm1155_vm4, %v1643_v49, %v1219_v52  ;;  %1376 = vst [vmem:[%s2209_s19 + $0x100] sm:$0xff] %v1312_v57  ;;  %v1315_v60 = vsel %vm1187_vm5, %v1675_v50, %v1251_v54  ;;  %vm1185_vm7 = vcmp.ge.f32.partialorder %v833_v56, 0.0  ;;  %v1249_v61 = vmul.f32 0.2, %v833_v56 }
 0x156   : > { %1347 = vst [vmem:[%s2209_s19 + $0x18] sm:$0xff] %v1283_v58  ;;  %1379 = vst [vmem:[%s2209_s19 + $0x118] sm:$0xff] %v1315_v60  ;;  %v1281_v62 = vsel %vm1153_vm6, %v705_v55, %v1217_v59  ;;  %v1646_v63 = vpop.f32.mrb[4].mxu0  ;;  %v1678_v0 = vpop.f32.mrb[4].mxu1 }
 0x157   : > { %1345 = vst [vmem:[%s2209_s19 + $0x8] sm:$0xff] %v1281_v62  ;;  %v1313_v1 = vsel %vm1185_vm7, %v833_v56, %v1249_v61  ;;  %vm1158_vm8 = vcmp.ge.f32.partialorder %v1646_v63, 0.0  ;;  %v1222_v2 = vmul.f32 0.2, %v1646_v63  ;;  %vm1190_vm9 = vcmp.ge.f32.partialorder %v1678_v0, 0.0  ;;  %v718_v3 = vpop.f32.mrb[5].mxu0 }
 0x158   : > { %v846_v4 = vpop.f32.mrb[5].mxu1  ;;  %1377 = vst [vmem:[%s2209_s19 + $0x108] sm:$0xff] %v1313_v1  ;;  %v1254_v5 = vmul.f32 0.2, %v1678_v0  ;;  %vm1156_vm10 = vcmp.ge.f32.partialorder %v718_v3, 0.0  ;;  %v1647_v9 = vpop.f32.mrb[6].mxu0 }
 0x159   : > { %v1220_v6 = vmul.f32 0.2, %v718_v3  ;;  %vm1188_vm11 = vcmp.ge.f32.partialorder %v846_v4, 0.0  ;;  %v1286_v7 = vsel %vm1158_vm8, %v1646_v63, %v1222_v2  ;;  %v1252_v8 = vmul.f32 0.2, %v846_v4  ;;  %v1679_v10 = vpop.f32.mrb[6].mxu1 }
 0x15a   : > { %1350 = vst [vmem:[%s2209_s19 + $0x30] sm:$0xff] %v1286_v7  ;;  %v1318_v11 = vsel %vm1190_vm9, %v1678_v0, %v1254_v5  ;;  %vm1159_vm12 = vcmp.ge.f32.partialorder %v1647_v9, 0.0  ;;  %v1223_v13 = vmul.f32 0.2, %v1647_v9  ;;  %v721_v14 = vpop.f32.mrb[7].mxu0  ;;  %v849_v15 = vpop.f32.mrb[7].mxu1 }
 0x15b   : > { %v1284_v12 = vsel %vm1156_vm10, %v718_v3, %v1220_v6  ;;  %1382 = vst [vmem:[%s2209_s19 + $0x130] sm:$0xff] %v1318_v11  ;;  %v1316_v16 = vsel %vm1188_vm11, %v846_v4, %v1252_v8  ;;  %vm1191_vm13 = vcmp.ge.f32.partialorder %v1679_v10, 0.0  ;;  %v1255_v17 = vmul.f32 0.2, %v1679_v10 }
 0x15c   : > { %1348 = vst [vmem:[%s2209_s19 + $0x20] sm:$0xff] %v1284_v12  ;;  %vm1157_vm14 = vcmp.ge.f32.partialorder %v721_v14, 0.0  ;;  %1380 = vst [vmem:[%s2209_s19 + $0x120] sm:$0xff] %v1316_v16  ;;  %v1287_v18 = vsel %vm1159_vm12, %v1647_v9, %v1223_v13  ;;  %v1221_v19 = vmul.f32 0.2, %v721_v14  ;;  %vm1189_vm15 = vcmp.ge.f32.partialorder %v849_v15, 0.0 }
 0x15d   : > { %v1253_v20 = vmul.f32 0.2, %v849_v15  ;;  %1351 = vst [vmem:[%s2209_s19 + $0x38] sm:$0xff] %v1287_v18  ;;  %v1319_v21 = vsel %vm1191_vm13, %v1679_v10, %v1255_v17 }
 0x15e   : > { %1383 = vst [vmem:[%s2209_s19 + $0x138] sm:$0xff] %v1319_v21  ;;  %v1285_v22 = vsel %vm1157_vm14, %v721_v14, %v1221_v19  ;;  %v1650_v24 = vpop.f32.mrb[8].mxu0  ;;  %v1682_v25 = vpop.f32.mrb[8].mxu1 }
 0x15f   : > { %v1317_v23 = vsel %vm1189_vm15, %v849_v15, %v1253_v20  ;;  %1349 = vst [vmem:[%s2209_s19 + $0x28] sm:$0xff] %v1285_v22  ;;  %vm1162_vm0 = vcmp.ge.f32.partialorder %v1650_v24, 0.0  ;;  %v1226_v26 = vmul.f32 0.2, %v1650_v24  ;;  %vm1194_vm1 = vcmp.ge.f32.partialorder %v1682_v25, 0.0  ;;  %v734_v28 = vpop.f32.mrb[9].mxu0 }
 0x160   : > { %1381 = vst [vmem:[%s2209_s19 + $0x128] sm:$0xff] %v1317_v23  ;;  %v1258_v27 = vmul.f32 0.2, %v1682_v25  ;;  %v862_v29 = vpop.f32.mrb[9].mxu1  ;;  %vm1160_vm2 = vcmp.ge.f32.partialorder %v734_v28, 0.0  ;;  %v1651_v33 = vpop.f32.mrb[10].mxu0 }
 0x161   : > { %v1290_v30 = vsel %vm1162_vm0, %v1650_v24, %v1226_v26  ;;  %v1224_v32 = vmul.f32 0.2, %v734_v28  ;;  %v1683_v34 = vpop.f32.mrb[10].mxu1  ;;  %vm1192_vm3 = vcmp.ge.f32.partialorder %v862_v29, 0.0  ;;  %v1256_v35 = vmul.f32 0.2, %v862_v29 }
 0x162   : > { %v1322_v31 = vsel %vm1194_vm1, %v1682_v25, %v1258_v27  ;;  %1354 = vst [vmem:[%s2209_s19 + $0x50] sm:$0xff] %v1290_v30  ;;  %vm1163_vm4 = vcmp.ge.f32.partialorder %v1651_v33, 0.0  ;;  %v1227_v36 = vmul.f32 0.2, %v1651_v33  ;;  %vm1195_vm5 = vcmp.ge.f32.partialorder %v1683_v34, 0.0  ;;  %v737_v39 = vpop.f32.mrb[11].mxu0 }
 0x163   : > { %1386 = vst [vmem:[%s2209_s19 + $0x150] sm:$0xff] %v1322_v31  ;;  %v1288_v37 = vsel %vm1160_vm2, %v734_v28, %v1224_v32  ;;  %v1259_v38 = vmul.f32 0.2, %v1683_v34  ;;  %v865_v40 = vpop.f32.mrb[11].mxu1  ;;  %v1320_v41 = vsel %vm1192_vm3, %v862_v29, %v1256_v35  ;;  %vm1161_vm6 = vcmp.ge.f32.partialorder %v737_v39, 0.0 }
 0x164   : > { %1352 = vst [vmem:[%s2209_s19 + $0x40] sm:$0xff] %v1288_v37  ;;  %v1291_v42 = vsel %vm1163_vm4, %v1651_v33, %v1227_v36  ;;  %v1225_v43 = vmul.f32 0.2, %v737_v39  ;;  %1384 = vst [vmem:[%s2209_s19 + $0x140] sm:$0xff] %v1320_v41  ;;  %vm1193_vm7 = vcmp.ge.f32.partialorder %v865_v40, 0.0 }
 0x165   : > { %1355 = vst [vmem:[%s2209_s19 + $0x58] sm:$0xff] %v1291_v42  ;;  %v1323_v44 = vsel %vm1195_vm5, %v1683_v34, %v1259_v38  ;;  %v1257_v45 = vmul.f32 0.2, %v865_v40 }
 0x166   : > { %1387 = vst [vmem:[%s2209_s19 + $0x158] sm:$0xff] %v1323_v44  ;;  %v1289_v46 = vsel %vm1161_vm6, %v737_v39, %v1225_v43  ;;  %v1654_v47 = vpop.f32.mrb[12].mxu0  ;;  %v1686_v48 = vpop.f32.mrb[12].mxu1 }
 0x167   : > { %1353 = vst [vmem:[%s2209_s19 + $0x48] sm:$0xff] %v1289_v46  ;;  %v1321_v49 = vsel %vm1193_vm7, %v865_v40, %v1257_v45  ;;  %vm1166_vm8 = vcmp.ge.f32.partialorder %v1654_v47, 0.0  ;;  %v1230_v50 = vmul.f32 0.2, %v1654_v47  ;;  %vm1198_vm9 = vcmp.ge.f32.partialorder %v1686_v48, 0.0  ;;  %v750_v51 = vpop.f32.mrb[13].mxu0 }
 0x168   : > { %v878_v52 = vpop.f32.mrb[13].mxu1  ;;  %1385 = vst [vmem:[%s2209_s19 + $0x148] sm:$0xff] %v1321_v49  ;;  %v1262_v53 = vmul.f32 0.2, %v1686_v48  ;;  %vm1164_vm10 = vcmp.ge.f32.partialorder %v750_v51, 0.0  ;;  %v1655_v57 = vpop.f32.mrb[14].mxu0 }
 0x169   : > { %v1228_v54 = vmul.f32 0.2, %v750_v51  ;;  %vm1196_vm11 = vcmp.ge.f32.partialorder %v878_v52, 0.0  ;;  %v1294_v55 = vsel %vm1166_vm8, %v1654_v47, %v1230_v50  ;;  %v1260_v56 = vmul.f32 0.2, %v878_v52  ;;  %v1687_v58 = vpop.f32.mrb[14].mxu1 }
 0x16a   : > { %1358 = vst [vmem:[%s2209_s19 + $0x70] sm:$0xff] %v1294_v55  ;;  %v1326_v59 = vsel %vm1198_vm9, %v1686_v48, %v1262_v53  ;;  %vm1167_vm12 = vcmp.ge.f32.partialorder %v1655_v57, 0.0  ;;  %v1231_v61 = vmul.f32 0.2, %v1655_v57  ;;  %v753_v62 = vpop.f32.mrb[15].mxu0  ;;  %v881_v63 = vpop.f32.mrb[15].mxu1 }
 0x16b   : > { %v1292_v60 = vsel %vm1164_vm10, %v750_v51, %v1228_v54  ;;  %1390 = vst [vmem:[%s2209_s19 + $0x170] sm:$0xff] %v1326_v59  ;;  %v1324_v0 = vsel %vm1196_vm11, %v878_v52, %v1260_v56  ;;  %vm1199_vm13 = vcmp.ge.f32.partialorder %v1687_v58, 0.0  ;;  %v1263_v1 = vmul.f32 0.2, %v1687_v58 }
 0x16c   : > { %1356 = vst [vmem:[%s2209_s19 + $0x60] sm:$0xff] %v1292_v60  ;;  %vm1165_vm14 = vcmp.ge.f32.partialorder %v753_v62, 0.0  ;;  %1388 = vst [vmem:[%s2209_s19 + $0x160] sm:$0xff] %v1324_v0  ;;  %v1295_v2 = vsel %vm1167_vm12, %v1655_v57, %v1231_v61  ;;  %v1229_v3 = vmul.f32 0.2, %v753_v62  ;;  %vm1197_vm15 = vcmp.ge.f32.partialorder %v881_v63, 0.0 }
 0x16d   : > { %v1261_v4 = vmul.f32 0.2, %v881_v63  ;;  %1359 = vst [vmem:[%s2209_s19 + $0x78] sm:$0xff] %v1295_v2  ;;  %v1327_v5 = vsel %vm1199_vm13, %v1687_v58, %v1263_v1 }
 0x16e   : > { %1391 = vst [vmem:[%s2209_s19 + $0x178] sm:$0xff] %v1327_v5  ;;  %v1293_v6 = vsel %vm1165_vm14, %v753_v62, %v1229_v3  ;;  %v1658_v8 = vpop.f32.mrb[16].mxu0  ;;  %v1690_v9 = vpop.f32.mrb[16].mxu1 }
 0x16f   : > { %v1325_v7 = vsel %vm1197_vm15, %v881_v63, %v1261_v4  ;;  %1357 = vst [vmem:[%s2209_s19 + $0x68] sm:$0xff] %v1293_v6  ;;  %vm1170_vm0 = vcmp.ge.f32.partialorder %v1658_v8, 0.0  ;;  %v1234_v10 = vmul.f32 0.2, %v1658_v8  ;;  %vm1202_vm1 = vcmp.ge.f32.partialorder %v1690_v9, 0.0  ;;  %v766_v12 = vpop.f32.mrb[17].mxu0 }
 0x170   : > { %1389 = vst [vmem:[%s2209_s19 + $0x168] sm:$0xff] %v1325_v7  ;;  %v1266_v11 = vmul.f32 0.2, %v1690_v9  ;;  %v894_v13 = vpop.f32.mrb[17].mxu1  ;;  %vm1168_vm2 = vcmp.ge.f32.partialorder %v766_v12, 0.0  ;;  %v1659_v17 = vpop.f32.mrb[18].mxu0 }
 0x171   : > { %v1298_v14 = vsel %vm1170_vm0, %v1658_v8, %v1234_v10  ;;  %v1232_v16 = vmul.f32 0.2, %v766_v12  ;;  %v1691_v18 = vpop.f32.mrb[18].mxu1  ;;  %vm1200_vm3 = vcmp.ge.f32.partialorder %v894_v13, 0.0  ;;  %v1264_v19 = vmul.f32 0.2, %v894_v13 }
 0x172   : > { %v1330_v15 = vsel %vm1202_vm1, %v1690_v9, %v1266_v11  ;;  %1362 = vst [vmem:[%s2209_s19 + $0x90] sm:$0xff] %v1298_v14  ;;  %vm1171_vm4 = vcmp.ge.f32.partialorder %v1659_v17, 0.0  ;;  %v1235_v20 = vmul.f32 0.2, %v1659_v17  ;;  %vm1203_vm5 = vcmp.ge.f32.partialorder %v1691_v18, 0.0  ;;  %v769_v23 = vpop.f32.mrb[19].mxu0 }
 0x173   : > { %1394 = vst [vmem:[%s2209_s19 + $0x190] sm:$0xff] %v1330_v15  ;;  %v1296_v21 = vsel %vm1168_vm2, %v766_v12, %v1232_v16  ;;  %v1267_v22 = vmul.f32 0.2, %v1691_v18  ;;  %v897_v24 = vpop.f32.mrb[19].mxu1  ;;  %v1328_v25 = vsel %vm1200_vm3, %v894_v13, %v1264_v19  ;;  %vm1169_vm6 = vcmp.ge.f32.partialorder %v769_v23, 0.0 }
 0x174   : > { %1360 = vst [vmem:[%s2209_s19 + $0x80] sm:$0xff] %v1296_v21  ;;  %v1299_v26 = vsel %vm1171_vm4, %v1659_v17, %v1235_v20  ;;  %v1233_v27 = vmul.f32 0.2, %v769_v23  ;;  %1392 = vst [vmem:[%s2209_s19 + $0x180] sm:$0xff] %v1328_v25  ;;  %vm1201_vm7 = vcmp.ge.f32.partialorder %v897_v24, 0.0 }
 0x175   : > { %1363 = vst [vmem:[%s2209_s19 + $0x98] sm:$0xff] %v1299_v26  ;;  %v1331_v28 = vsel %vm1203_vm5, %v1691_v18, %v1267_v22  ;;  %v1265_v29 = vmul.f32 0.2, %v897_v24 }
 0x176   : > { %1395 = vst [vmem:[%s2209_s19 + $0x198] sm:$0xff] %v1331_v28  ;;  %v1297_v30 = vsel %vm1169_vm6, %v769_v23, %v1233_v27  ;;  %v1662_v31 = vpop.f32.mrb[20].mxu0  ;;  %v1694_v32 = vpop.f32.mrb[20].mxu1 }
 0x177   : > { %1361 = vst [vmem:[%s2209_s19 + $0x88] sm:$0xff] %v1297_v30  ;;  %v1329_v33 = vsel %vm1201_vm7, %v897_v24, %v1265_v29  ;;  %vm1174_vm8 = vcmp.ge.f32.partialorder %v1662_v31, 0.0  ;;  %v1238_v34 = vmul.f32 0.2, %v1662_v31  ;;  %vm1206_vm9 = vcmp.ge.f32.partialorder %v1694_v32, 0.0  ;;  %v782_v35 = vpop.f32.mrb[21].mxu0 }
 0x178   : > { %v910_v36 = vpop.f32.mrb[21].mxu1  ;;  %1393 = vst [vmem:[%s2209_s19 + $0x188] sm:$0xff] %v1329_v33  ;;  %v1270_v37 = vmul.f32 0.2, %v1694_v32  ;;  %vm1172_vm10 = vcmp.ge.f32.partialorder %v782_v35, 0.0  ;;  %v1663_v41 = vpop.f32.mrb[22].mxu0 }
 0x179   : > { %v1236_v38 = vmul.f32 0.2, %v782_v35  ;;  %vm1204_vm11 = vcmp.ge.f32.partialorder %v910_v36, 0.0  ;;  %v1302_v39 = vsel %vm1174_vm8, %v1662_v31, %v1238_v34  ;;  %v1268_v40 = vmul.f32 0.2, %v910_v36  ;;  %v1695_v42 = vpop.f32.mrb[22].mxu1 }
 0x17a   : > { %1366 = vst [vmem:[%s2209_s19 + $0xb0] sm:$0xff] %v1302_v39  ;;  %v1334_v43 = vsel %vm1206_vm9, %v1694_v32, %v1270_v37  ;;  %vm1175_vm12 = vcmp.ge.f32.partialorder %v1663_v41, 0.0  ;;  %v1239_v45 = vmul.f32 0.2, %v1663_v41  ;;  %v785_v46 = vpop.f32.mrb[23].mxu0  ;;  %v913_v47 = vpop.f32.mrb[23].mxu1 }
 0x17b   : > { %v1300_v44 = vsel %vm1172_vm10, %v782_v35, %v1236_v38  ;;  %1398 = vst [vmem:[%s2209_s19 + $0x1b0] sm:$0xff] %v1334_v43  ;;  %v1332_v48 = vsel %vm1204_vm11, %v910_v36, %v1268_v40  ;;  %vm1207_vm13 = vcmp.ge.f32.partialorder %v1695_v42, 0.0  ;;  %v1271_v49 = vmul.f32 0.2, %v1695_v42 }
 0x17c   : > { %1364 = vst [vmem:[%s2209_s19 + $0xa0] sm:$0xff] %v1300_v44  ;;  %vm1173_vm14 = vcmp.ge.f32.partialorder %v785_v46, 0.0  ;;  %1396 = vst [vmem:[%s2209_s19 + $0x1a0] sm:$0xff] %v1332_v48  ;;  %v1303_v50 = vsel %vm1175_vm12, %v1663_v41, %v1239_v45  ;;  %v1237_v51 = vmul.f32 0.2, %v785_v46  ;;  %vm1205_vm15 = vcmp.ge.f32.partialorder %v913_v47, 0.0 }
 0x17d   : > { %v1269_v52 = vmul.f32 0.2, %v913_v47  ;;  %1367 = vst [vmem:[%s2209_s19 + $0xb8] sm:$0xff] %v1303_v50  ;;  %v1335_v53 = vsel %vm1207_vm13, %v1695_v42, %v1271_v49 }
 0x17e   : > { %1399 = vst [vmem:[%s2209_s19 + $0x1b8] sm:$0xff] %v1335_v53  ;;  %v1301_v54 = vsel %vm1173_vm14, %v785_v46, %v1237_v51  ;;  %v1666_v56 = vpop.f32.mrb[24].mxu0  ;;  %v1698_v57 = vpop.f32.mrb[24].mxu1 }
 0x17f   : > { %v1333_v55 = vsel %vm1205_vm15, %v913_v47, %v1269_v52  ;;  %1365 = vst [vmem:[%s2209_s19 + $0xa8] sm:$0xff] %v1301_v54  ;;  %vm1178_vm0 = vcmp.ge.f32.partialorder %v1666_v56, 0.0  ;;  %v1242_v58 = vmul.f32 0.2, %v1666_v56  ;;  %vm1210_vm1 = vcmp.ge.f32.partialorder %v1698_v57, 0.0  ;;  %v798_v60 = vpop.f32.mrb[25].mxu0 }
 0x180   : > { %1397 = vst [vmem:[%s2209_s19 + $0x1a8] sm:$0xff] %v1333_v55  ;;  %v1274_v59 = vmul.f32 0.2, %v1698_v57  ;;  %v926_v61 = vpop.f32.mrb[25].mxu1  ;;  %vm1176_vm2 = vcmp.ge.f32.partialorder %v798_v60, 0.0  ;;  %v1667_v1 = vpop.f32.mrb[26].mxu0 }
 0x181   : > { %v1306_v62 = vsel %vm1178_vm0, %v1666_v56, %v1242_v58  ;;  %v1240_v0 = vmul.f32 0.2, %v798_v60  ;;  %v1699_v2 = vpop.f32.mrb[26].mxu1  ;;  %vm1208_vm3 = vcmp.ge.f32.partialorder %v926_v61, 0.0  ;;  %v1272_v3 = vmul.f32 0.2, %v926_v61 }
 0x182   : > { %v1338_v63 = vsel %vm1210_vm1, %v1698_v57, %v1274_v59  ;;  %1370 = vst [vmem:[%s2209_s19 + $0xd0] sm:$0xff] %v1306_v62  ;;  %vm1179_vm4 = vcmp.ge.f32.partialorder %v1667_v1, 0.0  ;;  %v1243_v4 = vmul.f32 0.2, %v1667_v1  ;;  %vm1211_vm5 = vcmp.ge.f32.partialorder %v1699_v2, 0.0  ;;  %v801_v7 = vpop.f32.mrb[27].mxu0 }
 0x183   : > { %1402 = vst [vmem:[%s2209_s19 + $0x1d0] sm:$0xff] %v1338_v63  ;;  %v1304_v5 = vsel %vm1176_vm2, %v798_v60, %v1240_v0  ;;  %v1275_v6 = vmul.f32 0.2, %v1699_v2  ;;  %v929_v8 = vpop.f32.mrb[27].mxu1  ;;  %v1336_v9 = vsel %vm1208_vm3, %v926_v61, %v1272_v3  ;;  %vm1177_vm6 = vcmp.ge.f32.partialorder %v801_v7, 0.0 }
 0x184   : > { %1368 = vst [vmem:[%s2209_s19 + $0xc0] sm:$0xff] %v1304_v5  ;;  %v1307_v10 = vsel %vm1179_vm4, %v1667_v1, %v1243_v4  ;;  %v1241_v11 = vmul.f32 0.2, %v801_v7  ;;  %1400 = vst [vmem:[%s2209_s19 + $0x1c0] sm:$0xff] %v1336_v9  ;;  %vm1209_vm7 = vcmp.ge.f32.partialorder %v929_v8, 0.0 }
 0x185   : > { %1371 = vst [vmem:[%s2209_s19 + $0xd8] sm:$0xff] %v1307_v10  ;;  %v1339_v12 = vsel %vm1211_vm5, %v1699_v2, %v1275_v6  ;;  %v1273_v13 = vmul.f32 0.2, %v929_v8 }
 0x186   : > { %1403 = vst [vmem:[%s2209_s19 + $0x1d8] sm:$0xff] %v1339_v12  ;;  %v1305_v14 = vsel %vm1177_vm6, %v801_v7, %v1241_v11  ;;  %v1670_v15 = vpop.f32.mrb[28].mxu0  ;;  %v1702_v16 = vpop.f32.mrb[28].mxu1 }
 0x187   : > { %1369 = vst [vmem:[%s2209_s19 + $0xc8] sm:$0xff] %v1305_v14  ;;  %v1337_v17 = vsel %vm1209_vm7, %v929_v8, %v1273_v13  ;;  %vm1182_vm8 = vcmp.ge.f32.partialorder %v1670_v15, 0.0  ;;  %v1246_v18 = vmul.f32 0.2, %v1670_v15  ;;  %vm1214_vm9 = vcmp.ge.f32.partialorder %v1702_v16, 0.0  ;;  %v814_v19 = vpop.f32.mrb[29].mxu0 }
 0x188   : > { %v942_v20 = vpop.f32.mrb[29].mxu1  ;;  %1401 = vst [vmem:[%s2209_s19 + $0x1c8] sm:$0xff] %v1337_v17  ;;  %v1278_v21 = vmul.f32 0.2, %v1702_v16  ;;  %vm1180_vm10 = vcmp.ge.f32.partialorder %v814_v19, 0.0  ;;  %v1671_v25 = vpop.f32.mrb[30].mxu0 }
 0x189   : > { %v1244_v22 = vmul.f32 0.2, %v814_v19  ;;  %vm1212_vm11 = vcmp.ge.f32.partialorder %v942_v20, 0.0  ;;  %v1310_v23 = vsel %vm1182_vm8, %v1670_v15, %v1246_v18  ;;  %v1276_v24 = vmul.f32 0.2, %v942_v20  ;;  %v1703_v26 = vpop.f32.mrb[30].mxu1 }
 0x18a   : > { %1374 = vst [vmem:[%s2209_s19 + $0xf0] sm:$0xff] %v1310_v23  ;;  %v1342_v27 = vsel %vm1214_vm9, %v1702_v16, %v1278_v21  ;;  %vm1183_vm12 = vcmp.ge.f32.partialorder %v1671_v25, 0.0  ;;  %v1247_v29 = vmul.f32 0.2, %v1671_v25  ;;  %v817_v30 = vpop.f32.mrb[31].mxu0  ;;  %v945_v31 = vpop.f32.mrb[31].mxu1 }
 0x18b   : > { %v1308_v28 = vsel %vm1180_vm10, %v814_v19, %v1244_v22  ;;  %1406 = vst [vmem:[%s2209_s19 + $0x1f0] sm:$0xff] %v1342_v27  ;;  %v1340_v32 = vsel %vm1212_vm11, %v942_v20, %v1276_v24  ;;  %vm1215_vm13 = vcmp.ge.f32.partialorder %v1703_v26, 0.0  ;;  %v1279_v33 = vmul.f32 0.2, %v1703_v26 }
 0x18c   : > { %1372 = vst [vmem:[%s2209_s19 + $0xe0] sm:$0xff] %v1308_v28  ;;  %vm1181_vm14 = vcmp.ge.f32.partialorder %v817_v30, 0.0  ;;  %1404 = vst [vmem:[%s2209_s19 + $0x1e0] sm:$0xff] %v1340_v32  ;;  %v1311_v34 = vsel %vm1183_vm12, %v1671_v25, %v1247_v29  ;;  %v1245_v35 = vmul.f32 0.2, %v817_v30  ;;  %vm1213_vm15 = vcmp.ge.f32.partialorder %v945_v31, 0.0 }
 0x18d   : > { %v1277_v36 = vmul.f32 0.2, %v945_v31  ;;  %1375 = vst [vmem:[%s2209_s19 + $0xf8] sm:$0xff] %v1311_v34  ;;  %v1343_v37 = vsel %vm1215_vm13, %v1703_v26, %v1279_v33 }
 0x18e   : > { %1407 = vst [vmem:[%s2209_s19 + $0x1f8] sm:$0xff] %v1343_v37  ;;  %v1309_v38 = vsel %vm1181_vm14, %v817_v30, %v1245_v35 }
 0x18f   : > { %v1341_v39 = vsel %vm1213_vm15, %v945_v31, %v1277_v36  ;;  %1373 = vst [vmem:[%s2209_s19 + $0xe8] sm:$0xff] %v1309_v38 }
 0x190   : > { %1405 = vst [vmem:[%s2209_s19 + $0x1e8] sm:$0xff] %v1341_v39 }
 0x191   : > { %1908 = shalt.err (!%p1905_p5)
}
 0x192   : > { %s1909_s3 = scalar_lea.hbm %s2277_s4, 8192  ;;  %s1913_s27 = scalar_lea.hbm %s2333_s2, 32768 }
 0x193   : > { %p1910_p9 = scmp.ne.s32.totalorder %s2277_s4, %s1909_s3  ;;  %p1914_p3 = scmp.lt.u32.totalorder %s2277_s4, %s2333_s2 }
 0x194   : > { %p1915_p7 = scmp.lt.u32.totalorder %s1913_s27, %s1909_s3  ;;  %p1917_p4 = scmp.lt.u32.totalorder %s1909_s3, %s2277_s4 }
 0x195   : > { %p1911_p1 = pnand %p1910_p9, %p2103_p11 }
 0x196   : > { %p1916_p13 = por %p1915_p7, %p1914_p3 }
 0x197   : > { %p1912_p2 = pneg %p1911_p1 }
 0x198   : > { %p1918_p6 = por %p1917_p4, %p1916_p13 }
 0x19a   : > { %p1919_p8 = pnand %p1918_p6, %p1912_p2 }
 0x19c   : > { %1922 = shalt.err (!%p1919_p8)
}
 0x19d   : > { %s1988_s17 = smov 128   ;;  %s1989_s19 = smov 8  }
 0x19e   : > { %1726 = dma.vmem_to_hbm [thread:$0]  (%p2103_p11), %s2279_s6, 8192, %s2277_s4, %s1409_s5, %s1988_s17, %s1988_s17, %s1989_s19  }
 0x19f PF: > { %p1743_p12 = scmp.ge.s32.totalorder %s1981_s14, 2  ;;  %s1438_s21 = sand.u32 1, %s1961_s9  }
 0x1a0   : > { %p2351_p10 = scmp.ne.s32.totalorder %s2341_s20, 0  ;;  %s1439_s12 = scalar_lea.sflag [#allocation5], %s1438_s21 }
 0x1a2   : > { %p1737_p0 = pnand %p1743_p12, %p2351_p10 }
 0x1a4   : > { %1956 = dma.done.wait (!%p1737_p0), %s1439_s12, 8192  }
 0x1a5   : > { %1958 = vsyncadd (!%p1737_p0), %s1439_s12, 4294959104  ;;  %s19_s14 = sadd.s32 1, %s1981_s14   ;;  %s2352_s9 = smov %s1965_s10 }
 0x1a6   : > { %p16_p5 = scmp.ge.s32.totalorder %s19_s14, 6   ;;  %s2353_s10 = smov %s1969_s11 }
 0x1a7   : > { %s2354_s11 = smov %s2112_s28  ;;  %s2355_s12 = smov %s1977_s13 }
 0x1a8   : > { %s2356_s13 = smov %s2358_s25  ;;  %18 = sbr.rel (!%p16_p5) target bundleno = 7 (0x7), region = 86 }
 0x1af   :  { %1444 = vsyncpa [#allocation4], 1 }
 0x1b0   :  { %1446 = vsyncpa [#allocation4 + $0x1], 1 }
 0x1b1   :  { %1447 = vsyncpa [#allocation7], 1 }
 0x1b2   :  { %1448 = vsyncpa [#allocation5], 1 }
 0x1b3   :  { %1450 = vsyncpa [#allocation5 + $0x1], 1 }

</bundles_post_ra>
